<compile_context>
chip_gen: v6e
topology: v6e:2x2x1
jax: 0.10.0
libtpu: 0.0.40
codegen_flags: <defaults>
</compile_context>

<pallas_src>
import jax
import jax.numpy as jnp
from jax.experimental import pallas as pl
from jax.experimental.pallas import tpu as pltpu

LOG2 = float(jnp.log(2.0))
_LANE = 128
_SUBLANE = 8


def _round_up(x, m):
    return ((x + m - 1) // m) * m


def _shifted_softplus(x):
    # numerically-stable softplus(x) - log(2); f32 VPU/EUP math.
    return jnp.maximum(x, 0.0) + jnp.log1p(jnp.exp(-jnp.abs(x))) - LOG2


def mlp_kernel(x_ref, w1_ref, b1_ref, w2_ref, b2_ref, o_ref):
    # layer 0: Dense + shifted_softplus
    # MXU inputs take the weight dtype (f32 or bf16); accumulation is f32.
    x = x_ref[...].astype(w1_ref.dtype)
    h = jnp.dot(x, w1_ref[...], preferred_element_type=jnp.float32)
    h = h + b1_ref[...]              # b1 is (1, Hp) -> broadcasts over rows
    h = _shifted_softplus(h)         # f32
    # layer 1: Dense, no activation
    y = jnp.dot(h.astype(w2_ref.dtype), w2_ref[...],
                preferred_element_type=jnp.float32)
    y = y + b2_ref[...]
    o_ref[...] = y.astype(o_ref.dtype)


def mlp_forward(x, w1, b1, w2, b2, *, mxu_dtype=None, tile_m=1024):
    """x: (..., n_in); returns (..., n_out).

    mxu_dtype: optional dtype for the matmul inputs (e.g. jnp.bfloat16 on
               v6e/v7x). Accumulation / activation math stays in f32.
    tile_m:    max rows per grid step (VMEM use ~ tile_m * (n_in + 128) * 4B
               * 2 buffers -> well under the 32 MiB scoped default).
    """
    *lead, n_in = x.shape
    n_hidden = w1.shape[1]
    n_out = w2.shape[1]

    x2d = x.reshape((-1, n_in))
    m = x2d.shape[0]

    # --- pad hidden / output feature dims to a lane multiple (128) so the
    #     second matmul and the output stores are lane-dense. Padded weight
    #     rows/cols are zero, so results are exact.
    hp = _round_up(n_hidden, _LANE)
    op = _round_up(n_out, _LANE)

    w_dtype = mxu_dtype if mxu_dtype is not None else w1.dtype
    w1p = jnp.zeros((n_in, hp), w_dtype).at[:, :n_hidden].set(w1.astype(w_dtype))
    b1p = jnp.zeros((1, hp), jnp.float32).at[:, :n_hidden].set(
        b1.reshape(1, -1).astype(jnp.float32))
    w2p = jnp.zeros((hp, op), w_dtype).at[:n_hidden, :n_out].set(w2.astype(w_dtype))
    b2p = jnp.zeros((1, op), jnp.float32).at[:, :n_out].set(
        b2.reshape(1, -1).astype(jnp.float32))

    # --- tile the row dimension
    tm = min(tile_m, _round_up(m, _SUBLANE))
    grid = (pl.cdiv(m, tm),)

    out = pl.pallas_call(
        mlp_kernel,
        out_shape=jax.ShapeDtypeStruct((m, op), x.dtype),
        grid=grid,
        in_specs=[
            pl.BlockSpec((tm, n_in), lambda i: (i, 0)),   # x: moves with grid
            pl.BlockSpec((n_in, hp), lambda i: (0, 0)),   # weights/biases:
            pl.BlockSpec((1, hp), lambda i: (0, 0)),      #   constant block
            pl.BlockSpec((hp, op), lambda i: (0, 0)),     #   index -> stay
            pl.BlockSpec((1, op), lambda i: (0, 0)),      #   VMEM-resident
        ],
        out_specs=pl.BlockSpec((tm, op), lambda i: (i, 0)),
        compiler_params=pltpu.CompilerParams(
            dimension_semantics=("parallel",)),   # shard rows across TCs (v7x)
    )(x2d, w1p, b1p, w2p, b2p)

    return out[:, :n_out].reshape((*lead, n_out))


def init_mlp_params(key, n_in, n_out):
    """Deterministic xavier-uniform weights, zero biases (schnetpack Dense default)."""
    n_hidden = n_in // 2
    k1, k2 = jax.random.split(key)

    def xavier(k, fan_in, fan_out):
        limit = (6.0 / (fan_in + fan_out)) ** 0.5
        return jax.random.uniform(k, (fan_in, fan_out), jnp.float32,
                                  minval=-limit, maxval=limit)

    w1 = xavier(k1, n_in, n_hidden)
    b1 = jnp.zeros((1, n_hidden), jnp.float32)
    w2 = xavier(k2, n_hidden, n_out)
    b2 = jnp.zeros((1, n_out), jnp.float32)
    return w1, b1, w2, b2


def mlp_reference(x, w1, b1, w2, b2):
    h = x @ w1 + b1[0]
    h = jax.nn.softplus(h) - LOG2
    return h @ w2 + b2[0]


if __name__ == "__main__":
    key = jax.random.PRNGKey(0)
    kx, kp, kx2 = jax.random.split(key, 3)

    # small shapes consistent with the module: batch=2, atoms=8, n_in=32, n_out=8
    batch, n_atoms, n_in, n_out = 2, 8, 32, 8
    x = jax.random.normal(kx, (batch, n_atoms, n_in), jnp.float32)
    w1, b1, w2, b2 = init_mlp_params(kp, n_in, n_out)

    # f32 path, strict tolerance
    out = mlp_forward(x, w1, b1, w2, b2)
    out = jax.block_until_ready(out)
    ref = mlp_reference(x, w1, b1, w2, b2)
    assert out.shape == (batch, n_atoms, n_out)
    assert jnp.allclose(out, ref, atol=1e-5, rtol=1e-5), "f32 mismatch vs reference"

    # exercise the M-tiled pipeline (grid > 1, remainder tile) + bf16 MXU path
    big = jax.random.normal(kx2, (3, 700, n_in), jnp.float32)   # m = 2100 rows
    out_big = mlp_forward(big, w1, b1, w2, b2, tile_m=1024)
    out_big = jax.block_until_ready(out_big)
    ref_big = mlp_reference(big, w1, b1, w2, b2)
    assert out_big.shape == (3, 700, n_out)
    assert jnp.allclose(out_big, ref_big, atol=1e-4, rtol=1e-4), "tiled f32 mismatch"

    out_bf16 = mlp_forward(big, w1, b1, w2, b2, mxu_dtype=jnp.bfloat16, tile_m=1024)
    out_bf16 = jax.block_until_ready(out_bf16)
    assert jnp.allclose(out_bf16, ref_big, atol=1e-1, rtol=1e-1), "bf16 MXU drift too large"

    print("KERNEL_OK")
</pallas_src>

<mosaic_0001>
module attributes {stable_mosaic.version = 11 : i64} {
  func.func @mlp_kernel(%arg0: i32, %arg1: memref<16x32xf32, #tpu.memory_space<vmem>>, %arg2: memref<32x128xf32, #tpu.memory_space<vmem>>, %arg3: memref<1x128xf32, #tpu.memory_space<vmem>>, %arg4: memref<128x128xf32, #tpu.memory_space<vmem>>, %arg5: memref<1x128xf32, #tpu.memory_space<vmem>>, %arg6: memref<16x128xf32, #tpu.memory_space<vmem>>) attributes {dimension_semantics = [#tpu.dimension_semantics<parallel>], iteration_bounds = array<i64: 1>, scalar_prefetch = 0 : i64, scratch_operands = 0 : i64, tpu.core_type = #tpu.core_type<tc>, window_params = [{transform_indices = @transform_0, window_bounds = array<i64: 16, 32>}, {pipeline_mode = #tpu.pipeline_mode<synchronous>, transform_indices = @transform_1, window_bounds = array<i64: 32, 128>}, {pipeline_mode = #tpu.pipeline_mode<synchronous>, transform_indices = @transform_2, window_bounds = array<i64: 1, 128>}, {pipeline_mode = #tpu.pipeline_mode<synchronous>, transform_indices = @transform_3, window_bounds = array<i64: 128, 128>}, {pipeline_mode = #tpu.pipeline_mode<synchronous>, transform_indices = @transform_4, window_bounds = array<i64: 1, 128>}, {transform_indices = @transform_5, window_bounds = array<i64: 16, 128>}]} {
    %c0 = arith.constant 0 : index
    %c0_0 = arith.constant 0 : index
    %0 = vector.load %arg1[%c0, %c0_0] : memref<16x32xf32, #tpu.memory_space<vmem>>, vector<16x32xf32>
    %c0_1 = arith.constant 0 : index
    %c0_2 = arith.constant 0 : index
    %1 = vector.load %arg2[%c0_1, %c0_2] : memref<32x128xf32, #tpu.memory_space<vmem>>, vector<32x128xf32>
    %cst = arith.constant dense<0.000000e+00> : vector<16x128xf32>
    %2 = tpu.matmul %0, %1, %cst {dimension_numbers = #tpu.dot_dimension_numbers<[1], [0], [0], [1], [0, 0, 1, 1], [], []>} : vector<16x32xf32>, vector<32x128xf32>, vector<16x128xf32> -> vector<16x128xf32>
    %c0_3 = arith.constant 0 : index
    %c0_4 = arith.constant 0 : index
    %3 = vector.load %arg3[%c0_3, %c0_4] : memref<1x128xf32, #tpu.memory_space<vmem>>, vector<1x128xf32>
    %4 = vector.broadcast %3 : vector<1x128xf32> to vector<16x128xf32>
    %5 = arith.addf %2, %4 : vector<16x128xf32>
    %cst_5 = arith.constant 0.000000e+00 : f32
    %6 = vector.broadcast %cst_5 : f32 to vector<16x128xf32>
    %7 = arith.maximumf %5, %6 : vector<16x128xf32>
    %8 = math.absf %5 : vector<16x128xf32>
    %cst_6 = arith.constant 0.000000e+00 : f32
    %9 = vector.broadcast %cst_6 : f32 to vector<16x128xf32>
    %10 = arith.subf %9, %8 : vector<16x128xf32>
    %11 = math.exp %10 : vector<16x128xf32>
    %12 = math.log1p %11 : vector<16x128xf32>
    %13 = arith.addf %7, %12 : vector<16x128xf32>
    %cst_7 = arith.constant 0.693147182 : f32
    %14 = vector.broadcast %cst_7 : f32 to vector<16x128xf32>
    %15 = arith.subf %13, %14 : vector<16x128xf32>
    %c0_8 = arith.constant 0 : index
    %c0_9 = arith.constant 0 : index
    %16 = vector.load %arg4[%c0_8, %c0_9] : memref<128x128xf32, #tpu.memory_space<vmem>>, vector<128x128xf32>
    %cst_10 = arith.constant dense<0.000000e+00> : vector<16x128xf32>
    %17 = tpu.matmul %15, %16, %cst_10 {dimension_numbers = #tpu.dot_dimension_numbers<[1], [0], [0], [1], [0, 0, 1, 1], [], []>} : vector<16x128xf32>, vector<128x128xf32>, vector<16x128xf32> -> vector<16x128xf32>
    %c0_11 = arith.constant 0 : index
    %c0_12 = arith.constant 0 : index
    %18 = vector.load %arg5[%c0_11, %c0_12] : memref<1x128xf32, #tpu.memory_space<vmem>>, vector<1x128xf32>
    %19 = vector.broadcast %18 : vector<1x128xf32> to vector<16x128xf32>
    %20 = arith.addf %17, %19 : vector<16x128xf32>
    %c0_13 = arith.constant 0 : index
    %c0_14 = arith.constant 0 : index
    %21 = vector.load %arg6[%c0_13, %c0_14] : memref<16x128xf32, #tpu.memory_space<vmem>>, vector<16x128xf32>
    tpu.vector_store %arg6[%c0_13, %c0_14], %20 {strides = array<i32>} : memref<16x128xf32, #tpu.memory_space<vmem>>, vector<16x128xf32>,
    return
  }
  func.func @transform_0(%arg0: i32) -> (i32, i32) {
    %c0_i32 = arith.constant 0 : i32
    %c0_i32_0 = arith.constant 0 : i32
    return %arg0, %c0_i32 : i32, i32
  }
  func.func @transform_1(%arg0: i32) -> (i32, i32) {
    %c0_i32 = arith.constant 0 : i32
    %c0_i32_0 = arith.constant 0 : i32
    %c0_i32_1 = arith.constant 0 : i32
    return %c0_i32, %c0_i32_0 : i32, i32
  }
  func.func @transform_2(%arg0: i32) -> (i32, i32) {
    %c0_i32 = arith.constant 0 : i32
    %c0_i32_0 = arith.constant 0 : i32
    %c0_i32_1 = arith.constant 0 : i32
    return %c0_i32, %c0_i32_0 : i32, i32
  }
  func.func @transform_3(%arg0: i32) -> (i32, i32) {
    %c0_i32 = arith.constant 0 : i32
    %c0_i32_0 = arith.constant 0 : i32
    %c0_i32_1 = arith.constant 0 : i32
    return %c0_i32, %c0_i32_0 : i32, i32
  }
  func.func @transform_4(%arg0: i32) -> (i32, i32) {
    %c0_i32 = arith.constant 0 : i32
    %c0_i32_0 = arith.constant 0 : i32
    %c0_i32_1 = arith.constant 0 : i32
    return %c0_i32, %c0_i32_0 : i32, i32
  }
  func.func @transform_5(%arg0: i32) -> (i32, i32) {
    %c0_i32 = arith.constant 0 : i32
    %c0_i32_0 = arith.constant 0 : i32
    return %arg0, %c0_i32 : i32, i32
  }
}

</mosaic_0001>

<bundles_post_ra>
// kernel: tpu_custom_call.1
= control target key start
LH: loop header
LB: loop body
LE: loop exit
PB: predicated region body
PF: predicated region fallthrough
CT: control target
= control target key end

     0   :  { %10 = vsyncpa [#allocation3], 0  ;;  %s551_s0 = inlined_call_operand.hbm [shape: f32[16,32], index: 0, kind: input, shape index: {}]   ;;  %s552_s1 = inlined_call_operand.hbm [shape: f32[32,128], index: 1, kind: input, shape index: {}]   ;;  %s553_s2 = inlined_call_operand.vmem [shape: f32[1,128], index: 2, kind: input, shape index: {}]   ;;  %s554_s3 = inlined_call_operand.hbm [shape: f32[128,128], index: 3, kind: input, shape index: {}]   ;;  %s555_s4 = inlined_call_operand.vmem [shape: f32[1,128], index: 4, kind: input, shape index: {}]   ;;  %s556_s5 = inlined_call_operand.hbm [shape: f32[16,128], index: 5, kind: output, shape index: {}]  }
   0x1   :  { %11 = vsyncpa [#allocation6], 0 }
   0x2   :  { %12 = vsyncpa [#allocation4], 0  ;;  %s483_s18 = smov [#allocation5]   ;;  %s484_s20 = smov [#allocation2]  }
   0x3   :  { %s30_s19 = sshll.u32 %s483_s18, 4  ;;  %s18_s21 = sshll.u32 %s484_s20, 4  ;;  %s31_s19 = int_to_ptr.vmem [resolvable:$true] %s30_s19  ;;  %s19_s21 = int_to_ptr.vmem [resolvable:$true] %s18_s21 }
   0x4   :  { %s405_s22 = scalar_lea.vmem %s31_s19, 512  ;;  %p410_p1 = scmp.lt.s32.totalorder %s31_s19, %s31_s19 }
   0x5   :  { %p406_p0 = scmp.ne.s32.totalorder %s31_s19, %s405_s22  ;;  %p411_p2 = scmp.lt.s32.totalorder %s405_s22, %s405_s22 }
   0x7   :  { %p412_p3 = por %p411_p2, %p410_p1 }
   0x9   :  { %p413_p4 = pnand %p412_p3, %p406_p0 }
   0xb   :  { %416 = shalt.err (!%p413_p4)
}
   0xc   :  { %s485_s23 = smov 128   ;;  %s486_s24 = smov 8  }
   0xd   :  { %36 = dma.hbm_to_vmem [thread:$0]  %s552_s1, 512, %s31_s19, [#allocation6], %s485_s23, %s485_s23, %s486_s24  }
   0xe   :  { %s425_s27 = scalar_lea.vmem %s19_s21, 256  ;;  %p430_p6 = scmp.lt.s32.totalorder %s19_s21, %s19_s21 }
   0xf   :  { %p426_p5 = scmp.ne.s32.totalorder %s19_s21, %s425_s27  ;;  %p431_p7 = scmp.lt.s32.totalorder %s425_s27, %s425_s27 }
  0x11   :  { %p432_p8 = por %p431_p7, %p430_p6 }
  0x13   :  { %p433_p9 = pnand %p432_p8, %p426_p5 }
  0x15   :  { %436 = shalt.err (!%p433_p9)
}
  0x16   :  { %24 = dma.hbm_to_vmem [thread:$0]  %s551_s0, 256, %s19_s21, [#allocation3], %s485_s23, %s485_s23, %s486_s24  }
  0x17   :  { %s487_s30 = smov [#allocation7]  }
  0x18   :  { %s44_s6 = sshll.u32 %s487_s30, 4  ;;  %s45_s6 = int_to_ptr.vmem [resolvable:$true] %s44_s6 }
  0x19   :  { %s445_s7 = scalar_lea.vmem %s45_s6, 2048  ;;  %p450_p11 = scmp.lt.s32.totalorder %s45_s6, %s45_s6 }
  0x1a   :  { %p446_p10 = scmp.ne.s32.totalorder %s45_s6, %s445_s7  ;;  %p451_p12 = scmp.lt.s32.totalorder %s445_s7, %s445_s7 }
  0x1c   :  { %p452_p13 = por %p451_p12, %p450_p11 }
  0x1e   :  { %p453_p0 = pnand %p452_p13, %p446_p10 }
  0x20   :  { %456 = shalt.err (!%p453_p0)
}
  0x21   :  { %50 = dma.hbm_to_vmem [thread:$0]  %s554_s3, 2048, %s45_s6, [#allocation6], %s485_s23, %s485_s23, %s486_s24  }
  0x22   :  { %477 = dma.done.wait [#allocation3], 256  }
  0x23   :  { %478 = vsyncadd [#allocation3], 4294967040 }
  0x24   :  { %479 = dma.done.wait [#allocation6], 2560  }
  0x25   :  { %480 = vsyncadd [#allocation6], 4294964736  ;;  %vm75_vm0 = vcmask 261120   ;;  %v67_v0 = vld [vmem:[#allocation5 + $0x18] sm:$0xff]  ;;  %v66_v1 = vld [vmem:[#allocation5 + $0x10] sm:$0xff]  ;;  %s488_s10 = smov [#allocation8]  }
  0x26   :  { %337 = vmatprep.subr.mxu0 %v67_v0  ;;  %v62_v2 = vld [vmem:[#allocation2] sm:$0xff]  ;;  %v65_v3 = vld [vmem:[#allocation5 + $0x8] sm:$0xff]  ;;  %v64_v4 = vld [vmem:[#allocation5] sm:$0xff]  ;;  %s294_s11 = sshll.u32 %s488_s10, 4  ;;  %s295_s11 = int_to_ptr.vmem [resolvable:$true] %s294_s11 }
  0x27   :  { %338 = vmatpush3.msra.mxu0 %v67_v0  ;;  %345 = vmatprep.mubr.msk.f32.mxu0 %vm75_vm0, %v62_v2  ;;  %v63_v5 = vld [vmem:[#allocation2 + $0x8] sm:$0xff]  ;;  %v203_v7 = vld [vmem:[#allocation7 + $0x70] sm:$0xff]  ;;  %v202_v8 = vld [vmem:[#allocation7 + $0x68] sm:$0xff]  ;;  %s457_s12 = scalar_lea.vmem %s295_s11, 256  ;;  %p462_p2 = scmp.lt.s32.totalorder %s295_s11, %s295_s11 }
  0x28   :  { %339 = vmatprep.subr.mxu0 %v66_v1  ;;  %v204_v6 = vld [vmem:[#allocation7 + $0x78] sm:$0xff]  ;;  %v201_v9 = vld [vmem:[#allocation7 + $0x60] sm:$0xff]  ;;  %v199_v11 = vld [vmem:[#allocation7 + $0x50] sm:$0xff]  ;;  %p458_p1 = scmp.ne.s32.totalorder %s295_s11, %s457_s12  ;;  %p463_p3 = scmp.lt.s32.totalorder %s457_s12, %s457_s12 }
  0x29   :  { %340 = vmatpush3.msra.mxu0 %v66_v1  ;;  %348 = vmatprep.subr.mxu1 %v204_v6  ;;  %v200_v10 = vld [vmem:[#allocation7 + $0x58] sm:$0xff]  ;;  %v198_v12 = vld [vmem:[#allocation7 + $0x48] sm:$0xff]  ;;  %v197_v13 = vld [vmem:[#allocation7 + $0x40] sm:$0xff] }
  0x2a   :  { %341 = vmatprep.subr.mxu0 %v65_v3  ;;  %349 = vmatpush3.msra.mxu1 %v204_v6  ;;  %v196_v14 = vld [vmem:[#allocation7 + $0x38] sm:$0xff]  ;;  %v195_v15 = vld [vmem:[#allocation7 + $0x30] sm:$0xff]  ;;  %v194_v16 = vld [vmem:[#allocation7 + $0x28] sm:$0xff]  ;;  %p464_p4 = por %p463_p3, %p462_p2 }
  0x2b   :  { %342 = vmatpush3.msra.mxu0 %v65_v3  ;;  %350 = vmatprep.subr.mxu1 %v203_v7  ;;  %v193_v17 = vld [vmem:[#allocation7 + $0x20] sm:$0xff]  ;;  %v192_v18 = vld [vmem:[#allocation7 + $0x18] sm:$0xff]  ;;  %v191_v19 = vld [vmem:[#allocation7 + $0x10] sm:$0xff] }
  0x2c   :  { %343 = vmatprep.subr.mxu0 %v64_v4  ;;  %351 = vmatpush3.msra.mxu1 %v203_v7  ;;  %v190_v20 = vld [vmem:[#allocation7 + $0x8] sm:$0xff]  ;;  %v189_v21 = vld [vmem:[#allocation7] sm:$0xff]  ;;  %v307_v22 = vld [vmem:[%s553_s2] ss:$0 sm:$0xff]  ;;  %p465_p5 = pnand %p464_p4, %p458_p1 }
  0x2d   :  { %344 = vmatpush3.msra.mxu0 %v64_v4  ;;  %352 = vmatprep.subr.mxu1 %v202_v8  ;;  %v312_v57 = vld [vmem:[%s555_s4] ss:$0 sm:$0xff] }
  0x2e   :  { %346 = vmatmul.mubr.msk.f32.vlgmr.msra.gmra.mxu0 %vm75_vm0, %v63_v5  ;;  %353 = vmatpush3.msra.mxu1 %v202_v8 }
  0x2f   :  { %354 = vmatprep.subr.mxu1 %v201_v9 }
  0x30   :  { %355 = vmatpush3.msra.mxu1 %v201_v9 }
  0x31   :  { %356 = vmatprep.subr.mxu1 %v200_v10 }
  0x32   :  { %357 = vmatpush3.msra.mxu1 %v200_v10 }
  0x33   :  { %358 = vmatprep.subr.mxu1 %v199_v11 }
  0x34   :  { %359 = vmatpush3.msra.mxu1 %v199_v11 }
  0x35   :  { %360 = vmatprep.subr.mxu1 %v198_v12 }
  0x36   :  { %361 = vmatpush3.msra.mxu1 %v198_v12 }
  0x37   :  { %362 = vmatprep.subr.mxu1 %v197_v13 }
  0x38   :  { %363 = vmatpush3.msra.mxu1 %v197_v13 }
  0x39   :  { %364 = vmatprep.subr.mxu1 %v196_v14 }
  0x3a   :  { %365 = vmatpush3.msra.mxu1 %v196_v14 }
  0x3b   :  { %366 = vmatprep.subr.mxu1 %v195_v15 }
  0x3c   :  { %367 = vmatpush3.msra.mxu1 %v195_v15 }
  0x3d   :  { %368 = vmatprep.subr.mxu1 %v194_v16 }
  0x3e   :  { %369 = vmatpush3.msra.mxu1 %v194_v16 }
  0x3f   :  { %370 = vmatprep.subr.mxu1 %v193_v17 }
  0x40   :  { %371 = vmatpush3.msra.mxu1 %v193_v17 }
  0x41   :  { %372 = vmatprep.subr.mxu1 %v192_v18 }
  0x42   :  { %373 = vmatpush3.msra.mxu1 %v192_v18 }
  0x43   :  { %374 = vmatprep.subr.mxu1 %v191_v19 }
  0x44   :  { %375 = vmatpush3.msra.mxu1 %v191_v19 }
  0x45   :  { %376 = vmatprep.subr.mxu1 %v190_v20 }
  0x46   :  { %377 = vmatpush3.msra.mxu1 %v190_v20 }
  0x47   :  { %378 = vmatprep.subr.mxu1 %v189_v21 }
  0x48   :  { %379 = vmatpush3.msra.mxu1 %v189_v21 }
  0xee   :  { %v347_v23 = vpop.f32.mrf.mxu0 }
  0xef   :  { %v154_v24 = vadd.f32 %v347_v23, %v307_v22 }
  0xf0   :  { %v148_v25 = vpop.f32.mrf.mxu0 }
  0xf1   :  { %v160_v26 = vand.u32 2147483647, %v154_v24  ;;  %v149_v27 = vadd.f32 %v307_v22, %v148_v25  ;;  %v158_v47 = vmax.f32 %v154_v24, 0.0 }
  0xf3   :  { %v162_v28 = vsub.f32 0.0, %v160_v26  ;;  %v159_v29 = vand.u32 2147483647, %v149_v27  ;;  %v157_v51 = vmax.f32 %v149_v27, 0.0 }
  0xf5   :  { %v165_v30 = vmul.f32 1.442695, %v162_v28  ;;  %v161_v31 = vsub.f32 0.0, %v159_v29 }
  0xf7   :  { %389 = vpow2.f32 %v165_v30  ;;  %v163_v32 = vmul.f32 1.442695, %v161_v31 }
  0xf9   :  { %391 = vpow2.f32 %v163_v32 }
 0x104   :  { %v390_v33 = vpop.eup %389 }
 0x105   :  { %v176_v34 = vadd.f32 1.0, %v390_v33  ;;  %v179_v37 = vmul.f32 -0.5, %v390_v33  ;;  %v182_v40 = vand.u32 2147483647, %v390_v33 }
 0x106   :  { %v392_v35 = vpop.eup %391 }
 0x107   :  { %v167_v36 = vadd.f32 1.0, %v392_v35  ;;  %393 = vlog2.f32 %v176_v34  ;;  %v170_v38 = vmul.f32 -0.5, %v392_v35  ;;  %v180_v39 = vadd.f32 1.0, %v179_v37 }
 0x108   :  { %v173_v43 = vand.u32 2147483647, %v392_v35  ;;  %vm183_vm1 = vcmp.lt.f32.partialorder %v182_v40, 0.0004427343 }
 0x109   :  { %395 = vlog2.f32 %v167_v36  ;;  %v171_v41 = vadd.f32 1.0, %v170_v38  ;;  %v181_v45 = vmul.f32 %v390_v33, %v180_v39 }
 0x10a   :  { %vm174_vm2 = vcmp.lt.f32.partialorder %v173_v43, 0.0004427343 }
 0x10b   :  { %v172_v49 = vmul.f32 %v392_v35, %v171_v41 }
 0x114   :  { %v394_v42 = vpop.eup %393 }
 0x115   :  { %v178_v44 = vmul.f32 0.6931472, %v394_v42 }
 0x116   :  { %v396_v46 = vpop.eup %395 }
 0x117   :  { %v169_v48 = vmul.f32 0.6931472, %v396_v46  ;;  %v184_v50 = vsel %vm183_vm1, %v181_v45, %v178_v44 }
 0x118   :  { %v186_v53 = vadd.f32 %v184_v50, %v158_v47 }
 0x119   :  { %v175_v52 = vsel %vm174_vm2, %v172_v49, %v169_v48 }
 0x11a   :  { %v185_v54 = vadd.f32 %v175_v52, %v157_v51  ;;  %v311_v56 = vadd.f32 -0.6931472, %v186_v53 }
 0x11c   :  { %v310_v55 = vadd.f32 -0.6931472, %v185_v54 }
 0x11e   :  { %380 = vmatprep.mubr.f32.mxu1 %v310_v55 }
 0x11f   :  { %381 = vmatmul.mubr.f32.vlgmr.msra.gmra.mxu1 %v311_v56 }
 0x1df   :  { %v382_v58 = vpop.f32.mrf.mxu1 }
 0x1e0   :  { %v284_v59 = vadd.f32 %v382_v58, %v312_v57 }
 0x1e1   :  { %v278_v60 = vpop.f32.mrf.mxu1 }
 0x1e2   :  { %288 = vst [vmem:[#allocation8 + $0x8] sm:$0xff] %v284_v59  ;;  %v279_v61 = vadd.f32 %v312_v57, %v278_v60 }
 0x1e4   :  { %287 = vst [vmem:[#allocation8] sm:$0xff] %v279_v61 }
 0x1e5   :  { %468 = shalt.err (!%p465_p5)
}
 0x1e6   :  { %300 = dma.vmem_to_hbm [thread:$0]  %s295_s11, 256, %s556_s5, [#allocation4], %s485_s23, %s485_s23, %s486_s24  }
 0x1e7   :  { %481 = dma.done.wait [#allocation4], 256  }
 0x1e8   :  { %482 = vsyncadd [#allocation4], 4294967040 }
 0x1e9   :  { %304 = vsyncpa [#allocation3], 1 }
 0x1ea   :  { %305 = vsyncpa [#allocation6], 1 }
 0x1eb   :  { %306 = vsyncpa [#allocation4], 1 }

</bundles_post_ra>
